<compile_context>
chip_gen: v5e
topology: v5e:2x2
jax: 0.10.0
libtpu: 0.0.40
codegen_flags: <defaults>
</compile_context>

<pallas_src>
import functools

import jax
import jax.numpy as jnp
from jax import lax
from jax.experimental import pallas as pl
from jax.experimental.pallas import tpu as pltpu


# ------------------------------ tiling helper ------------------------------ #

def _pick_tile(dim, target):
    """Use `target` when it divides the dim, otherwise fall back to the full
    dim (fine for the small demo shapes; real configs use 128-multiples)."""
    if dim <= target:
        return dim
    return target if dim % target == 0 else dim


# --------------------------- QKV projection kernel -------------------------- #

def _qkv_proj_kernel(x_ref, w_ref, o_ref, acc_ref):
    # x tile: (tm, tk); w tile: (1, head_dim, tk)  (native (out,in) layout)
    @pl.when(pl.program_id(2) == 0)
    def _():
        acc_ref[...] = jnp.zeros_like(acc_ref)

    acc_ref[...] += lax.dot_general(
        x_ref[...], w_ref[0],
        dimension_numbers=(((1,), (1,)), ((), ())),   # contract K on both
        preferred_element_type=jnp.float32)

    @pl.when(pl.program_id(2) == pl.num_programs(2) - 1)
    def _():
        o_ref[0] = acc_ref[...].astype(o_ref.dtype)


def qkv_projection(x, w_hdk, *, tm_target=256, tk_target=512):
    """x: (S, dim); w_hdk: (H_total, head_dim, dim) -> (H_total, S, head_dim)."""
    S, K = x.shape
    h_total, D, _ = w_hdk.shape
    tm = _pick_tile(S, tm_target)
    tk = _pick_tile(K, tk_target)
    grid = (h_total, S // tm, K // tk)
    return pl.pallas_call(
        _qkv_proj_kernel,
        out_shape=jax.ShapeDtypeStruct((h_total, S, D), x.dtype),
        grid=grid,
        in_specs=[
            pl.BlockSpec((tm, tk), lambda h, i, kk: (i, kk)),
            pl.BlockSpec((1, D, tk), lambda h, i, kk: (h, 0, kk)),
        ],
        out_specs=pl.BlockSpec((1, tm, D), lambda h, i, kk: (h, i, 0)),
        scratch_shapes=[pltpu.VMEM((tm, D), jnp.float32)],
        compiler_params=pltpu.CompilerParams(
            dimension_semantics=("parallel", "parallel", "arbitrary")),
    )(x, w_hdk)


# -------------------- flash attention (RoPE + GQA fused) -------------------- #

def _flash_attn_kernel(q_ref, k_ref, v_ref, cq_ref, sq_ref, ck_ref, sk_ref,
                       p_ref, o_ref, m_sc, l_sc, acc_sc, qrot_sc, *, scale):
    ki = pl.program_id(2)

    @pl.when(ki == 0)
    def _():
        # RoPE(q) once per (head, q-tile), pre-scaled by the softmax scale so
        # the O(tq*tk) score matrix never needs a scalar multiply.
        q = q_ref[0].astype(jnp.float32)
        q_swapped = jnp.dot(q, p_ref[...], preferred_element_type=jnp.float32)
        qrot_sc[...] = (q * cq_ref[...] + q_swapped * sq_ref[...]) * scale
        m_sc[...] = jnp.full_like(m_sc, -jnp.inf)
        l_sc[...] = jnp.zeros_like(l_sc)
        acc_sc[...] = jnp.zeros_like(acc_sc)

    # RoPE(k) on the streaming kv tile (v is not rotated).
    k = k_ref[0].astype(jnp.float32)
    k_swapped = jnp.dot(k, p_ref[...], preferred_element_type=jnp.float32)
    k_rot = k * ck_ref[...] + k_swapped * sk_ref[...]
    v = v_ref[0]

    # online softmax update
    s = lax.dot_general(qrot_sc[...], k_rot,
                        dimension_numbers=(((1,), (1,)), ((), ())),
                        preferred_element_type=jnp.float32)         # (tq, tk)
    m_new = jnp.maximum(m_sc[...], jnp.max(s, axis=-1, keepdims=True))
    alpha = jnp.exp(m_sc[...] - m_new)
    p = jnp.exp(s - m_new)
    l_sc[...] = alpha * l_sc[...] + jnp.sum(p, axis=-1, keepdims=True)
    acc_sc[...] = alpha * acc_sc[...] + jnp.dot(
        p.astype(v.dtype), v, preferred_element_type=jnp.float32)
    m_sc[...] = m_new

    @pl.when(ki == pl.num_programs(2) - 1)
    def _():
        o_ref[0] = (acc_sc[...] *
                    pl.reciprocal(l_sc[...], approx=True)).astype(o_ref.dtype)


def flash_attention(qkv, rope_cos, rope_sin, pswap, n_heads, n_kv_heads, scale,
                    *, tq_target=256, tk_target=256):
    """qkv: (n_heads + 2*n_kv_heads, S, D) -> (n_heads, S, D)."""
    _, S, D = qkv.shape
    repeats = n_heads // n_kv_heads
    tq = _pick_tile(S, tq_target)
    tk = _pick_tile(S, tk_target)
    grid = (n_heads, S // tq, S // tk)

    q_spec = pl.BlockSpec((1, tq, D), lambda h, qi, ki: (h, qi, 0))
    # GQA: no jnp.repeat — K/V blocks alias the shared kv head in the qkv slab.
    k_spec = pl.BlockSpec(
        (1, tk, D), lambda h, qi, ki: (n_heads + h // repeats, ki, 0))
    v_spec = pl.BlockSpec(
        (1, tk, D),
        lambda h, qi, ki: (n_heads + n_kv_heads + h // repeats, ki, 0))
    rope_q_spec = pl.BlockSpec((tq, D), lambda h, qi, ki: (qi, 0))
    rope_k_spec = pl.BlockSpec((tk, D), lambda h, qi, ki: (ki, 0))
    pswap_spec = pl.BlockSpec((D, D), lambda h, qi, ki: (0, 0))

    return pl.pallas_call(
        functools.partial(_flash_attn_kernel, scale=scale),
        out_shape=jax.ShapeDtypeStruct((n_heads, S, D), qkv.dtype),
        grid=grid,
        in_specs=[q_spec, k_spec, v_spec,
                  rope_q_spec, rope_q_spec, rope_k_spec, rope_k_spec,
                  pswap_spec],
        out_specs=pl.BlockSpec((1, tq, D), lambda h, qi, ki: (h, qi, 0)),
        scratch_shapes=[
            pltpu.VMEM((tq, 1), jnp.float32),   # m
            pltpu.VMEM((tq, 1), jnp.float32),   # l
            pltpu.VMEM((tq, D), jnp.float32),   # acc
            pltpu.VMEM((tq, D), jnp.float32),   # rotated, pre-scaled q
        ],
        compiler_params=pltpu.CompilerParams(
            dimension_semantics=("parallel", "parallel", "arbitrary")),
    )(qkv, qkv, qkv, rope_cos, rope_sin, rope_cos, rope_sin, pswap)


# -------------------- output projection (head-reduction) -------------------- #

def _out_proj_kernel(a_ref, w_ref, o_ref, acc_ref):
    # a tile: (1, tm, D) of head h;  w tile: (1, tn, D) = wo[:, h*D:(h+1)*D] rows
    @pl.when(pl.program_id(2) == 0)
    def _():
        acc_ref[...] = jnp.zeros_like(acc_ref)

    acc_ref[...] += lax.dot_general(
        a_ref[0], w_ref[0],
        dimension_numbers=(((1,), (1,)), ((), ())),   # contract head_dim
        preferred_element_type=jnp.float32)

    @pl.when(pl.program_id(2) == pl.num_programs(2) - 1)
    def _():
        o_ref[...] = acc_ref[...].astype(o_ref.dtype)


def output_projection(attn, wo_r, *, tm_target=256, tn_target=256):
    """attn: (H, S, D); wo_r: (H, dim, D) -> (S, dim).  Fuses the
    (H,S,D)->(S,H*D) layout change and the wo matmul (H is the reduction)."""
    H, S, D = attn.shape
    _, dim, _ = wo_r.shape
    tm = _pick_tile(S, tm_target)
    tn = _pick_tile(dim, tn_target)
    grid = (S // tm, dim // tn, H)
    return pl.pallas_call(
        _out_proj_kernel,
        out_shape=jax.ShapeDtypeStruct((S, dim), attn.dtype),
        grid=grid,
        in_specs=[
            pl.BlockSpec((1, tm, D), lambda i, j, h: (h, i, 0)),
            pl.BlockSpec((1, tn, D), lambda i, j, h: (h, j, 0)),
        ],
        out_specs=pl.BlockSpec((tm, tn), lambda i, j, h: (i, j)),
        scratch_shapes=[pltpu.VMEM((tm, tn), jnp.float32)],
        compiler_params=pltpu.CompilerParams(
            dimension_semantics=("parallel", "parallel", "arbitrary")),
    )(attn, wo_r)


# ------------------------------- glue (JAX) --------------------------------- #

def precompute_freqs_cis(head_dim, seqlen, theta=10000.0):
    """cos, sin of shape (seqlen, head_dim // 2) (interleaved-pair convention)."""
    inv_freq = 1.0 / (theta ** (jnp.arange(0, head_dim, 2, dtype=jnp.float32)
                                / head_dim))
    t = jnp.arange(seqlen, dtype=jnp.float32)
    angles = jnp.outer(t, inv_freq)
    return jnp.cos(angles), jnp.sin(angles)


def _expand_rope_tables(cos, sin):
    """(S, D/2) -> full-width (S, D) tables for the fused-RoPE kernel:
    cos_full[:,2i]=cos_full[:,2i+1]=cos[:,i];  sin_signed[:,2i]=-sin[:,i],
    sin_signed[:,2i+1]=+sin[:,i]."""
    S, half = cos.shape
    cos_full = jnp.repeat(cos, 2, axis=-1)
    sin_signed = jnp.stack([-sin, sin], axis=-1).reshape(S, 2 * half)
    return cos_full, sin_signed


def _pair_swap_matrix(head_dim):
    """Constant (D, D) matrix with (x @ P)[2i] = x[2i+1], (x @ P)[2i+1] = x[2i]."""
    idx = jnp.arange(head_dim)
    return (idx[:, None] == (idx[None, :] ^ 1)).astype(jnp.float32)


def attention_forward(x, params, cos, sin, n_heads, n_kv_heads, head_dim):
    """Reproduces Attention.forward with cache=None."""
    assert n_heads % n_kv_heads == 0
    scale = head_dim ** (-0.5)
    h_total = n_heads + 2 * n_kv_heads
    S, dim = x.shape

    # One-time weight packing (would be done at checkpoint-load time in real
    # use — note the QKV pack is a pure reshape, no transpose of HBM data).
    w_qkv = jnp.concatenate(
        [params["wq"], params["wk"], params["wv"]], axis=0
    ).reshape(h_total, head_dim, dim)                                   # (Ht,D,K)
    wo_r = params["wo"].reshape(dim, n_heads, head_dim).transpose(1, 0, 2)  # (H,dim,D)

    rope_cos, rope_sin = _expand_rope_tables(cos, sin)                  # (S,D)
    pswap = _pair_swap_matrix(head_dim)                                 # (D,D)

    qkv = qkv_projection(x, w_qkv)                                      # (Ht,S,D)
    attn = flash_attention(qkv, rope_cos, rope_sin, pswap,
                           n_heads, n_kv_heads, scale)                  # (H,S,D)
    return output_projection(attn, wo_r)                                # (S,dim)


# --------------------------- pure-JAX reference ------------------------------ #

def _apply_rotary_emb_ref(x, cos, sin):
    x_r = x[..., 0::2]
    x_i = x[..., 1::2]
    c = cos[:, None, :]
    s = sin[:, None, :]
    out_r = x_r * c - x_i * s
    out_i = x_r * s + x_i * c
    return jnp.stack([out_r, out_i], axis=-1).reshape(x.shape).astype(x.dtype)


def reference_forward(x, params, cos, sin, n_heads, n_kv_heads, head_dim):
    seqlen_sum, _ = x.shape
    repeats = n_heads // n_kv_heads
    scale = head_dim ** (-0.5)
    xq = (x @ params["wq"].T).reshape(seqlen_sum, n_heads, head_dim)
    xk = (x @ params["wk"].T).reshape(seqlen_sum, n_kv_heads, head_dim)
    xv = (x @ params["wv"].T).reshape(seqlen_sum, n_kv_heads, head_dim)
    xq = _apply_rotary_emb_ref(xq, cos, sin)
    xk = _apply_rotary_emb_ref(xk, cos, sin)
    key = jnp.repeat(xk, repeats, axis=1)
    val = jnp.repeat(xv, repeats, axis=1)
    q_h = jnp.transpose(xq, (1, 0, 2))
    k_h = jnp.transpose(key, (1, 0, 2))
    v_h = jnp.transpose(val, (1, 0, 2))
    s = jnp.einsum("hqd,hkd->hqk", q_h, k_h) * scale
    p = jax.nn.softmax(s, axis=-1)
    o_h = jnp.einsum("hqk,hkd->hqd", p, v_h)
    out = jnp.transpose(o_h, (1, 0, 2)).reshape(seqlen_sum, n_heads * head_dim)
    return out @ params["wo"].T


# ----------------------------------- main ------------------------------------ #

if __name__ == "__main__":
    # TransformerModelArgs (small): dim=32, n_heads=4, n_kv_heads=2, head_dim=8
    dim, n_heads, n_kv_heads, head_dim = 32, 4, 2, 8
    seqlen_sum = 8

    key = jax.random.PRNGKey(0)
    kx, kq, kk, kv, ko = jax.random.split(key, 5)

    x = jax.random.normal(kx, (seqlen_sum, dim), dtype=jnp.float32)
    params = {
        "wq": jax.random.normal(kq, (n_heads * head_dim, dim), jnp.float32) * 0.1,
        "wk": jax.random.normal(kk, (n_kv_heads * head_dim, dim), jnp.float32) * 0.1,
        "wv": jax.random.normal(kv, (n_kv_heads * head_dim, dim), jnp.float32) * 0.1,
        "wo": jax.random.normal(ko, (dim, n_heads * head_dim), jnp.float32) * 0.1,
    }
    cos, sin = precompute_freqs_cis(head_dim, seqlen_sum)

    out = attention_forward(x, params, cos, sin, n_heads, n_kv_heads, head_dim)
    out = jax.block_until_ready(out)

    ref = reference_forward(x, params, cos, sin, n_heads, n_kv_heads, head_dim)
    assert out.shape == (seqlen_sum, dim)
    # Tolerance slightly relaxed for pl.reciprocal(approx=True) in the softmax
    # normalization (EUP approximate reciprocal).
    assert jnp.allclose(out, ref, rtol=2e-3, atol=2e-3), "mismatch vs JAX reference"

    print("KERNEL_OK")
</pallas_src>

<mosaic_0001>
module attributes {stable_mosaic.version = 11 : i64} {
  func.func @_qkv_proj_kernel(%arg0: i32, %arg1: i32, %arg2: i32, %arg3: memref<8x32xf32, #tpu.memory_space<vmem>>, %arg4: memref<1x8x32xf32, #tpu.memory_space<vmem>>, %arg5: memref<1x8x8xf32, #tpu.memory_space<vmem>>, %arg6: memref<8x8xf32, #tpu.memory_space<vmem>>) attributes {dimension_semantics = [#tpu.dimension_semantics<parallel>, #tpu.dimension_semantics<parallel>, #tpu.dimension_semantics<arbitrary>], iteration_bounds = array<i64: 8, 1, 1>, scalar_prefetch = 0 : i64, scratch_operands = 1 : i64, tpu.core_type = #tpu.core_type<tc>, window_params = [{transform_indices = @transform_0, window_bounds = array<i64: 8, 32>}, {transform_indices = @transform_1, window_bounds = array<i64: 1, 8, 32>}, {transform_indices = @transform_2, window_bounds = array<i64: 1, 8, 8>}]} {
    %c0_i32 = arith.constant 0 : i32
    %0 = arith.cmpi eq, %arg2, %c0_i32 : i32
    %1 = arith.extui %0 : i1 to i32
    %c0_i32_0 = arith.constant 0 : i32
    %2 = arith.cmpi ne, %1, %c0_i32_0 : i32
    scf.if %2 {
      %cst_11 = arith.constant 0.000000e+00 : f32
      %13 = vector.broadcast %cst_11 : f32 to vector<8x8xf32>
      %c0_12 = arith.constant 0 : index
      %c0_13 = arith.constant 0 : index
      %14 = vector.load %arg6[%c0_12, %c0_13] : memref<8x8xf32, #tpu.memory_space<vmem>>, vector<8x8xf32>
      tpu.vector_store %arg6[%c0_12, %c0_13], %13 {strides = array<i32>} : memref<8x8xf32, #tpu.memory_space<vmem>>, vector<8x8xf32>,
    } else {
    }
    %c0 = arith.constant 0 : index
    %c0_1 = arith.constant 0 : index
    %3 = vector.load %arg6[%c0, %c0_1] : memref<8x8xf32, #tpu.memory_space<vmem>>, vector<8x8xf32>
    %c0_2 = arith.constant 0 : index
    %c0_3 = arith.constant 0 : index
    %4 = vector.load %arg3[%c0_2, %c0_3] : memref<8x32xf32, #tpu.memory_space<vmem>>, vector<8x32xf32>
    %c0_4 = arith.constant 0 : index
    %c0_5 = arith.constant 0 : index
    %c0_6 = arith.constant 0 : index
    %5 = vector.load %arg4[%c0_4, %c0_5, %c0_6] : memref<1x8x32xf32, #tpu.memory_space<vmem>>, vector<1x8x32xf32>
    %6 = vector.shape_cast %5 : vector<1x8x32xf32> to vector<8x32xf32>
    %cst = arith.constant dense<0.000000e+00> : vector<8x8xf32>
    %7 = tpu.matmul %4, %6, %cst {dimension_numbers = #tpu.dot_dimension_numbers<[1], [1], [0], [0], [0, 0, 1, 0], [], []>} : vector<8x32xf32>, vector<8x32xf32>, vector<8x8xf32> -> vector<8x8xf32>
    %8 = arith.addf %3, %7 : vector<8x8xf32>
    %c0_7 = arith.constant 0 : index
    %c0_8 = arith.constant 0 : index
    %9 = vector.load %arg6[%c0_7, %c0_8] : memref<8x8xf32, #tpu.memory_space<vmem>>, vector<8x8xf32>
    tpu.vector_store %arg6[%c0_7, %c0_8], %8 {strides = array<i32>} : memref<8x8xf32, #tpu.memory_space<vmem>>, vector<8x8xf32>,
    %c0_i32_9 = arith.constant 0 : i32
    %10 = arith.cmpi eq, %arg2, %c0_i32_9 : i32
    %11 = arith.extui %10 : i1 to i32
    %c0_i32_10 = arith.constant 0 : i32
    %12 = arith.cmpi ne, %11, %c0_i32_10 : i32
    scf.if %12 {
      %c0_11 = arith.constant 0 : index
      %c0_12 = arith.constant 0 : index
      %13 = vector.load %arg6[%c0_11, %c0_12] : memref<8x8xf32, #tpu.memory_space<vmem>>, vector<8x8xf32>
      %c0_13 = arith.constant 0 : index
      %c0_14 = arith.constant 0 : index
      %c0_15 = arith.constant 0 : index
      %14 = vector.load %arg5[%c0_13, %c0_14, %c0_15] : memref<1x8x8xf32, #tpu.memory_space<vmem>>, vector<1x8x8xf32>
      %15 = vector.shape_cast %14 : vector<1x8x8xf32> to vector<8x8xf32>
      %16 = vector.shape_cast %13 : vector<8x8xf32> to vector<1x8x8xf32>
      tpu.vector_store %arg5[%c0_13, %c0_14, %c0_15], %16 {strides = array<i32>} : memref<1x8x8xf32, #tpu.memory_space<vmem>>, vector<1x8x8xf32>,
    } else {
    }
    return
  }
  func.func @transform_0(%arg0: i32, %arg1: i32, %arg2: i32) -> (i32, i32) {
    %c0_i32 = arith.constant 0 : i32
    return %arg1, %arg2 : i32, i32
  }
  func.func @transform_1(%arg0: i32, %arg1: i32, %arg2: i32) -> (i32, i32, i32) {
    %c0_i32 = arith.constant 0 : i32
    %c0_i32_0 = arith.constant 0 : i32
    return %arg0, %c0_i32, %arg2 : i32, i32, i32
  }
  func.func @transform_2(%arg0: i32, %arg1: i32, %arg2: i32) -> (i32, i32, i32) {
    %c0_i32 = arith.constant 0 : i32
    %c0_i32_0 = arith.constant 0 : i32
    return %arg0, %arg1, %c0_i32 : i32, i32, i32
  }
}

</mosaic_0001>

<bundles_post_ra>
// kernel: tpu_custom_call.1
= control target key start
LH: loop header
LB: loop body
LE: loop exit
PB: predicated region body
PF: predicated region fallthrough
CT: control target
= control target key end

     0   :  { %7 = vsyncpa [#allocation4], 0  ;;  %s775_s0 = inlined_call_operand.hbm [shape: f32[8,32], index: 0, kind: input, shape index: {}]   ;;  %s776_s1 = inlined_call_operand.hbm [shape: f32[8,8,32], index: 1, kind: input, shape index: {}]   ;;  %s777_s2 = inlined_call_operand.hbm [shape: f32[8,8,8], index: 2, kind: output, shape index: {}]  }
   0x1   :  { %8 = vsyncpa [#allocation7], 0 }
   0x2   :  { %10 = vsyncpa [#allocation7 + $0x1], 0 }
   0x3   :  { %11 = vsyncpa [#allocation5], 0 }
   0x4   :  { %13 = vsyncpa [#allocation5 + $0x1], 0  ;;  %s625_s9 = smov 0   ;;  %s627_s10 = smov 0  }
   0x5   :  { %s629_s11 = smov 0   ;;  %s631_s12 = smov 0  }
   0x6   :  { %s633_s13 = smov 0   ;;  %s635_s14 = smov 0  }
   0x7 LB: > { %s369_s15 = sadd.s32 4294967295, %s606_s14   ;;  %s370_s16 = sadd.s32 4294967294, %s606_s14   ;;  %s606_s14 = sphi %s635_s14, %s19_s14   ;;  %s602_s13 = sphi %s633_s13, %s789_s13   ;;  %s598_s12 = sphi %s631_s12, %s788_s12   ;;  %s594_s11 = sphi %s629_s11, %s787_s11   ;;  %s590_s10 = sphi %s627_s10, %s786_s10   ;;  %s586_s9 = sphi %s625_s9, %s785_s9  }
   0x8   : > { %p88_p0 = scmp.ne.s32.totalorder %s590_s10, %s586_s9  ;;  %p659_p1 = scmp.eq.s32.totalorder %s369_s15, 0 }
   0x9   : > { %p663_p2 = scmp.eq.s32.totalorder %s369_s15, 7  ;;  %p120_p3 = scmp.eq.s32.totalorder %s370_s16, 7 }
   0xa   : > { %p669_p4 = por %p659_p1, %p88_p0  ;;  %p371_p5 = scmp.ge.s32.totalorder %s606_s14, 1 }
   0xb   : > { %p674_p6 = por %p120_p3, %p88_p0  ;;  %p127_p7 = scmp.lt.s32.totalorder %s606_s14, 9 }
   0xc   : > { %s142_s23 = sshll.u32 %s775_s0, 4  ;;  %s608_s25 = smov [#allocation3]   ;;  %s143_s23 = int_to_ptr.hbm [resolvable:$true] %s142_s23 }
   0xd   : > { %p682_p8 = pnand %p371_p5, %p127_p7  ;;  %s144_s26 = sshll.u32 %s608_s25, 4  ;;  %s145_s26 = int_to_ptr.vmem [resolvable:$true] %s144_s26 }
   0xe   : > { %s38_s27 = sadd.s32 1, %s602_s13  ;;  %s75_s28 = sadd.s32 1, %s594_s11 }
   0xf   : > { %p394_p9 = pneg %p682_p8  ;;  %p40_p11 = scmp.ge.s32.totalorder %s38_s27, 8 }
  0x10   : > { %p82_p12 = scmp.ne.s32.totalorder %s594_s11, %s590_s10  ;;  %p83_p13 = scmp.eq.s32.totalorder %s606_s14, 0 }
  0x11   : > { %p395_p10 = pnand %p394_p9, %p659_p1  ;;  %s791_s27 = smov (%p40_p11, %s38_s27), 0 }
  0x12   : > { %p697_p0 = por %p83_p13, %p82_p12  ;;  %p703_p3 = por %p663_p2, %p82_p12 }
  0x13   : > { %397 = dma.hbm_to_vmem [thread:$0]  (!%p395_p10), %s143_s23, 128, %s145_s26, [#allocation4]  }
  0x14   : > { %s70_s3 = ssub.s32 %s602_s13, %s791_s27  ;;  %p407_p5 = scmp.lt.s32.totalorder %s606_s14, 8 }
  0x15   : > { %p73_p7 = scmp.eq.s32.totalorder %s70_s3, 0  ;;  %s155_s4 = sand.u32 1, %s594_s11  }
  0x16   : > { %s374_s5 = sshll.u32 %s155_s4, 3  ;;  %s375_s7 = sshll.u32 %s602_s13, 3 }
  0x17   : > { %s712_s6 = scalar_select %p73_p7, %s594_s11, %s75_s28  }
  0x18   : > { %s164_s16 = scalar_lea.hbm %s776_s1, %s375_s7  ;;  %s159_s21 = scalar_lea.vmem [#allocation6], %s374_s5 }
  0x19   : > { %s168_s22 = sshll.u32 %s159_s21, 4  ;;  %s166_s18 = sshll.u32 %s164_s16, 4  ;;  %s169_s22 = int_to_ptr.vmem [resolvable:$true] %s168_s22  ;;  %s167_s18 = int_to_ptr.hbm [resolvable:$true] %s166_s18 }
  0x1a   : > { %p399_p2 = pnand %p407_p5, %p697_p0  ;;  %s156_s23 = scalar_lea.sflag [#allocation7], %s155_s4 }
  0x1b   : > { %177 = sbr.rel (%p682_p8) target bundleno = 180 (0xb4), region = 28 }
  0x1c   : > { %401 = dma.hbm_to_vmem [thread:$0]  (!%p399_p2), %s167_s18, 128, %s169_s22, %s156_s23  }
  0x20   : > { %573 = dma.done.wait (%p659_p1), [#allocation4], 128  }
  0x21   : > { %575 = vsyncadd (%p659_p1), [#allocation4], 4294967168  ;;  %s727_s25 = sand.u32 1, %s590_s10  }
  0x22   : > { %s378_s26 = sshll.u32 %s727_s25, 3  ;;  %s185_s28 = scalar_lea.sflag [#allocation7], %s727_s25 }
  0x23   : > { %s188_s29 = scalar_lea.vmem [#allocation6], %s378_s26 }
  0x24   : > { %577 = dma.done.wait (%p669_p4), %s185_s28, 128  }
  0x25   : > { %579 = vsyncadd (%p669_p4), %s185_s28, 4294967168  ;;  %vm214_vm0 = vcmask 64512   ;;  %v609_v0 = vmov 0.0   ;;  %vm219_vm1 = vcmask 261120   ;;  %v218_v1 = vld [vmem:[%s188_s29] sm:$0xff]  ;;  %v217_v2 = vld [vmem:[#allocation3] sm:$0xff] }
  0x26   : > { %215 = vst.msk [vmem:[#allocation2] sm:$0xff] %vm214_vm0, %v609_v0  ;;  %380 = vmatpush.xpose.msk.msra.mxu0 %vm219_vm1, %v218_v1  ;;  %s383_s17 = sshll.u32 %s598_s12, 3  ;;  %s209_s4 = scalar_lea.vmem [#allocation8], %s378_s26 }
  0x27   : > { %s266_s3 = scalar_lea.hbm %s777_s2, %s383_s17  ;;  %s268_s5 = sshll.u32 %s209_s4, 4  ;;  %s269_s5 = int_to_ptr.vmem [resolvable:$true] %s268_s5 }
  0x28   : > { %s270_s7 = sshll.u32 %s266_s3, 4  ;;  %s255_s8 = scalar_lea.sflag [#allocation5], %s727_s25  ;;  %s271_s7 = int_to_ptr.hbm [resolvable:$true] %s270_s7 }
  0x29   : > { %381 = vmatmul.msk.f32.vlgmr.msra.gmra.mxu0 %vm219_vm1, %v217_v2  ;;  %s534_s15 = sshra.s32 %s271_s7, 4  ;;  %s540_s22 = scalar_lea.hbm %s777_s2, 64  ;;  %s535_s15 = int_to_ptr.hbm [resolvable:$true] %s534_s15 }
  0x2a   : > { %s536_s12 = scalar_lea.hbm %s535_s15, 8  ;;  %p541_p9 = scmp.lt.s32.totalorder %s535_s15, %s777_s2 }
  0x2b   : > { %p537_p1 = scmp.ne.s32.totalorder %s535_s15, %s536_s12  ;;  %p542_p10 = scmp.lt.s32.totalorder %s540_s22, %s536_s12 }
  0x2d   : > { %v216_v3 = vld [vmem:[#allocation2] sm:$0xff]  ;;  %p538_p4 = pnand %p537_p1, %p703_p3  ;;  %p543_p11 = por %p542_p10, %p541_p9 }
  0x2f   : > { %p539_p8 = pneg %p538_p4 }
  0x31   : > { %p544_p12 = pnand %p543_p11, %p539_p8 }
  0xa6   : > { %v243_v4 = vpop.f32.mrf.mxu0 }
  0xa7   : > { %v246_v5 = vadd.f32 %v243_v4, %v216_v3 }
  0xa9   : > { %248 = vst.msk [vmem:[#allocation2] sm:$0xff] %vm214_vm0, %v246_v5 }
  0xb0   : > { %v252_v6 = vld [vmem:[#allocation2] sm:$0xff] }
  0xb1   : > { %253 = vst.msk [vmem:[%s209_s4] sm:$0xff] %vm214_vm0, %v252_v6 }
  0xb2   : > { %547 = shalt.err (!%p544_p12)
}
  0xb3   : > { %392 = dma.vmem_to_hbm [thread:$0]  (%p703_p3), %s269_s5, 128, %s271_s7, %s255_s8  }
  0xb4 PF: > { %p409_p13 = scmp.ge.s32.totalorder %s606_s14, 2  ;;  %s282_s25 = sand.u32 1, %s586_s9  }
  0xb5   : > { %s283_s26 = scalar_lea.sflag [#allocation5], %s282_s25 }
  0xb6   : > { %p403_p0 = pnand %p409_p13, %p674_p6 }
  0xb8   : > { %p404_p5 = pneg %p403_p0 }
  0xba   : > { %581 = dma.done.wait (%p404_p5), %s283_s26, 128  }
  0xbb   : > { %583 = vsyncadd (%p404_p5), %s283_s26, 4294967168  ;;  %s19_s14 = sadd.s32 1, %s606_s14   ;;  %s785_s9 = smov %s590_s10 }
  0xbc   : > { %p16_p7 = scmp.ge.s32.totalorder %s19_s14, 10   ;;  %s786_s10 = smov %s594_s11 }
  0xbd   : > { %s787_s11 = smov %s712_s6  ;;  %s788_s12 = smov %s602_s13 }
  0xbe   : > { %s789_s13 = smov %s791_s27  ;;  %18 = sbr.rel (!%p16_p7) target bundleno = 7 (0x7), region = 87 }
  0xc3   :  { %289 = vsyncpa [#allocation4], 1 }
  0xc4   :  { %291 = vsyncpa [#allocation4 + $0x1], 1 }
  0xc5   :  { %292 = vsyncpa [#allocation7], 1 }
  0xc6   :  { %294 = vsyncpa [#allocation7 + $0x1], 1 }
  0xc7   :  { %295 = vsyncpa [#allocation5], 1 }
  0xc8   :  { %297 = vsyncpa [#allocation5 + $0x1], 1 }

</bundles_post_ra>
